<compile_context>
chip_gen: v7x
topology: tpu7x:2x2x1
jax: 0.10.0
libtpu: 0.0.40
codegen_flags: <defaults>
</compile_context>

<pallas_src>
import functools
from typing import NamedTuple, Tuple

import jax
import jax.numpy as jnp
from jax import lax
from jax.experimental import pallas as pl
from jax.experimental.pallas import tpu as pltpu

_SUBLANE = 8
_LANE = 128
_MAX_TB = 256  # max batch-tile rows (multiple of 8)


def _round_up(x, m):
    return ((x + m - 1) // m) * m


def _vmem_capacity_bytes():
    try:
        return int(pltpu.get_tpu_info().vmem_capacity_bytes)
    except Exception:
        return 64 * 1024 * 1024  # v7x floor; conservative & valid on every generation


class RegressionConfig(NamedTuple):
    """Static (hashable) kernel configuration produced by prepare_regression_params."""
    classes: int
    skip_first_quadrant: bool
    seg_feats: Tuple[int, ...]   # real feature count per input segment
    seg_pads: Tuple[int, ...]    # tk-padded feature count per input segment
    tk: int                      # K (feature) tile width
    c_pad: int                   # classes padded to 8 sublanes
    compute_dtype: str
    vmem_limit_bytes: int


class RegressionParams(NamedTuple):
    w_packed: jax.Array  # [n_k, c_pad, tk]  (zero-padded, K-blocked, PyTorch row order)
    bias: jax.Array      # [1, c_pad] f32, -1e30 on padded class lanes


def _choose_tk(seg_feats, x_itemsize):
    """Largest power-of-two K tile (<= dtype cap) that keeps padding waste small."""
    max_tk = 16384 if x_itemsize <= 2 else 8192
    real = sum(seg_feats)
    tk = _LANE
    t = _LANE
    while t * 2 <= max_tk:
        t *= 2
        padded = sum(_round_up(f, t) for f in seg_feats)
        if padded <= max(real + real // 4, real + _LANE):
            tk = t
    return tk


def prepare_regression_params(w, b, *, input_shape, skip_first_quadrant=False,
                              compute_dtype=jnp.float32):
    """One-time weight/bias preprocessing (hoisted out of the per-call path).

    Args:
      w: [classes, F] linear weight in the native PyTorch nn.Linear layout.
      b: [classes] bias.
      input_shape: [B, H, W, C] shape the forward will see (only H/W/C matter).
      skip_first_quadrant: mirror of the PyTorch module flag.
      compute_dtype: dtype the kernel computes in (use bf16 for bf16 activations).
    Returns:
      (RegressionParams, RegressionConfig)
    """
    classes, feats = w.shape
    _, H, W, C = input_shape
    if skip_first_quadrant:
        halfway = W // 2  # PyTorch uses x.shape[2] // 2
        seg_feats = ((H - halfway) * halfway * C, halfway * W * C)
    else:
        seg_feats = (H * W * C,)
    assert sum(seg_feats) == feats, (seg_feats, feats)
    assert b.shape == (classes,), b.shape

    x_itemsize = jnp.dtype(compute_dtype).itemsize
    c_pad = _round_up(classes, _SUBLANE)
    tk = _choose_tk(seg_feats, x_itemsize)

    # Generation-aware VMEM budget (double-buffered x tiles dominate).
    vmem_cap = _vmem_capacity_bytes()
    budget = min(vmem_cap - (8 << 20), 96 << 20)

    def footprint(tk_):
        seg_pads_ = tuple(_round_up(f, tk_) for f in seg_feats)
        f_total = sum(seg_pads_)
        return (len(seg_feats) * 2 * _MAX_TB * tk_ * x_itemsize   # x double buffers
                + 2 * c_pad * f_total * x_itemsize                # resident weight (worst case 2 bufs)
                + _MAX_TB * c_pad * 4                             # f32 accumulator scratch
                + 2 * _MAX_TB * c_pad * 4                         # output double buffer
                + 2 * _LANE * 4)                                  # bias

    while tk > _LANE and footprint(tk) > budget:
        tk //= 2

    seg_pads = tuple(_round_up(f, tk) for f in seg_feats)
    f_pad_total = sum(seg_pads)
    n_k = f_pad_total // tk

    # Pack the weight per segment so packed columns [k*tk, (k+1)*tk) always match
    # grid step k, then reshape to [n_k, c_pad, tk] for leading-dim indexing.
    w = jnp.asarray(w)
    parts = []
    off = 0
    for f, fp in zip(seg_feats, seg_pads):
        part = w[:, off:off + f]
        parts.append(jnp.pad(part, ((0, c_pad - classes), (0, fp - f))))
        off += f
    w_packed = jnp.concatenate(parts, axis=1).astype(compute_dtype)     # [c_pad, f_pad_total]
    w_packed = w_packed.reshape(c_pad, n_k, tk).transpose(1, 0, 2)      # [n_k, c_pad, tk]

    # Padded class lanes get a huge-negative bias so they vanish under softmax
    # (row max always comes from a real, finite logit, so no NaNs).
    bias = jnp.pad(jnp.asarray(b, jnp.float32).reshape(1, classes),
                   ((0, 0), (0, c_pad - classes)), constant_values=-1e30)

    vmem_limit = int(min(vmem_cap - (2 << 20),
                         max(2 * footprint(tk) + (4 << 20), 32 << 20)))

    cfg = RegressionConfig(
        classes=classes,
        skip_first_quadrant=bool(skip_first_quadrant),
        seg_feats=seg_feats,
        seg_pads=seg_pads,
        tk=tk,
        c_pad=c_pad,
        compute_dtype=jnp.dtype(compute_dtype).name,
        vmem_limit_bytes=vmem_limit,
    )
    return RegressionParams(w_packed=w_packed, bias=bias), cfg


def _make_regression_kernel(kb1, two_segments):
    """kb1: number of K blocks belonging to the first input segment."""

    def kernel(*refs):
        if two_segments:
            x1_ref, x2_ref, w_ref, b_ref, o_ref, acc_ref = refs
        else:
            x1_ref, w_ref, b_ref, o_ref, acc_ref = refs
            x2_ref = None
        k = pl.program_id(1)

        @pl.when(k == 0)
        def _init():
            acc_ref[...] = jnp.zeros_like(acc_ref)

        # Resident packed weight: pick this grid step's K window by leading index.
        w_blk = w_ref[k]  # [c_pad, tk]

        def _accum(x_ref):
            # [tb, tk] . [c_pad, tk] contracting the last dim of both -> [tb, c_pad]
            acc_ref[...] += lax.dot_general(
                x_ref[...], w_blk,
                dimension_numbers=(((1,), (1,)), ((), ())),
                preferred_element_type=jnp.float32)

        if two_segments:
            @pl.when(k < kb1)
            def _seg0():
                _accum(x1_ref)

            @pl.when(k >= kb1)
            def _seg1():
                _accum(x2_ref)
        else:
            _accum(x1_ref)

        @pl.when(k == pl.num_programs(1) - 1)
        def _finish():
            logits = acc_ref[...] + b_ref[...]
            # numerically stable log-softmax over the (8-lane) class axis
            m = jnp.max(logits, axis=-1, keepdims=True)
            z = logits - m
            lse = jnp.log(jnp.sum(jnp.exp(z), axis=-1, keepdims=True))
            o_ref[...] = (z - lse).astype(o_ref.dtype)

    return kernel


@functools.partial(jax.jit, static_argnames=("config",))
def regression_forward(x, params, config):
    """Forward pass of the Regression module: flatten -> Linear -> LogSoftmax.

    Args:
      x:      [B, H, W, C] input (channels-last, as the PyTorch module indexes it).
      params: RegressionParams from prepare_regression_params.
      config: RegressionConfig from prepare_regression_params.
    Returns:
      [B, classes] log-softmax outputs (float32).
    """
    batch = x.shape[0]
    dtype = jnp.dtype(config.compute_dtype)

    if config.skip_first_quadrant:
        halfway = x.shape[2] // 2
        # Same slicing / ordering as the PyTorch module (no concat copy: the two
        # pieces are separate kernel inputs accumulated over a combined K grid).
        segs = [x[:, halfway:, :halfway, :].reshape(batch, -1),
                x[:, :halfway, :, :].reshape(batch, -1)]
    else:
        segs = [x.reshape(batch, -1)]

    assert tuple(s.shape[-1] for s in segs) == config.seg_feats, (
        tuple(s.shape[-1] for s in segs), config.seg_feats)

    tk = config.tk
    c_pad = config.c_pad
    seg_pads = config.seg_pads
    f_pad_total = sum(seg_pads)
    kb = tuple(fp // tk for fp in seg_pads)
    n_k = sum(kb)

    b_pad = _round_up(batch, _SUBLANE)
    tb = min(b_pad, _MAX_TB)
    b_pad = _round_up(b_pad, tb)

    # Feature padding MUST stay explicit zeros (zero columns contribute nothing);
    # padded batch rows are sliced off at the end.
    segs_p = [jnp.pad(s.astype(dtype), ((0, b_pad - batch), (0, fp - s.shape[-1])))
              for s, fp in zip(segs, seg_pads)]

    two_seg = len(segs_p) == 2
    kernel = _make_regression_kernel(kb[0], two_seg)

    x_itemsize = dtype.itemsize
    cost = pl.CostEstimate(
        flops=2 * b_pad * f_pad_total * c_pad,
        transcendentals=2 * b_pad * c_pad,                   # exp + log
        bytes_accessed=(b_pad * f_pad_total * x_itemsize     # activation stream
                        + c_pad * f_pad_total * x_itemsize   # weight (fetched once, resident)
                        + c_pad * 4 * 2                      # bias
                        + b_pad * c_pad * 4),                # output
    )

    if two_seg:
        kb1 = kb[0]
        x_specs = [
            pl.BlockSpec((tb, tk), lambda i, k: (i, jnp.minimum(k, kb1 - 1))),
            pl.BlockSpec((tb, tk), lambda i, k: (i, jnp.maximum(k - kb1, 0))),
        ]
    else:
        x_specs = [pl.BlockSpec((tb, tk), lambda i, k: (i, k))]

    in_specs = x_specs + [
        # Whole packed weight: constant block index => DMA'd into VMEM exactly once.
        pl.BlockSpec((n_k, c_pad, tk), lambda i, k: (0, 0, 0)),
        pl.BlockSpec((1, c_pad), lambda i, k: (0, 0)),
    ]

    out = pl.pallas_call(
        kernel,
        out_shape=jax.ShapeDtypeStruct((b_pad, c_pad), jnp.float32),
        grid_spec=pltpu.PrefetchScalarGridSpec(
            num_scalar_prefetch=0,
            grid=(b_pad // tb, n_k),
            in_specs=in_specs,
            out_specs=pl.BlockSpec((tb, c_pad), lambda i, k: (i, 0)),
            scratch_shapes=[pltpu.VMEM((tb, c_pad), jnp.float32)],
        ),
        compiler_params=pltpu.CompilerParams(
            dimension_semantics=("parallel", "arbitrary"),
            vmem_limit_bytes=config.vmem_limit_bytes,
        ),
        cost_estimate=cost,
    )(*segs_p, params.w_packed, params.bias)

    return out[:batch, :config.classes]


if __name__ == "__main__":
    # Small shapes consistent with the module's forward (channels-last images):
    # the real module uses 128x128x3 -> classes; here 16x16x3 -> 4 classes.
    B, H, W, C = 2, 16, 16, 3
    classes = 4

    key = jax.random.PRNGKey(0)
    kx, kw, kb_ = jax.random.split(key, 3)
    x = jax.random.normal(kx, (B, H, W, C), jnp.float32)

    # --- full-image path ------------------------------------------------------
    feats = H * W * C  # 768
    bound = 1.0 / jnp.sqrt(jnp.float32(feats))
    w = jax.random.uniform(kw, (classes, feats), jnp.float32, -bound, bound)   # PyTorch layout
    b = jax.random.uniform(kb_, (classes,), jnp.float32, -bound, bound)

    params, cfg = prepare_regression_params(
        w, b, input_shape=(B, H, W, C), skip_first_quadrant=False,
        compute_dtype=jnp.float32)
    out = jax.block_until_ready(regression_forward(x, params, cfg))
    ref = jax.nn.log_softmax(x.reshape(B, -1) @ w.T + b, axis=-1)
    assert out.shape == (B, classes)
    assert jnp.allclose(out, ref, atol=1e-4, rtol=1e-4), (out, ref)

    # --- skip_first_quadrant path (same slicing/concat order as PyTorch) -----
    halfway = W // 2
    feats_q = (H - halfway) * halfway * C + halfway * W * C  # 576
    bound_q = 1.0 / jnp.sqrt(jnp.float32(feats_q))
    w_q = jax.random.uniform(kw, (classes, feats_q), jnp.float32, -bound_q, bound_q)
    b_q = jax.random.uniform(kb_, (classes,), jnp.float32, -bound_q, bound_q)

    params_q, cfg_q = prepare_regression_params(
        w_q, b_q, input_shape=(B, H, W, C), skip_first_quadrant=True,
        compute_dtype=jnp.float32)
    out_q = jax.block_until_ready(regression_forward(x, params_q, cfg_q))
    xq = jnp.concatenate(
        [x[:, halfway:, :halfway, :].reshape(B, -1),
         x[:, :halfway, :, :].reshape(B, -1)], axis=-1)
    ref_q = jax.nn.log_softmax(xq @ w_q.T + b_q, axis=-1)
    assert out_q.shape == (B, classes)
    assert jnp.allclose(out_q, ref_q, atol=1e-4, rtol=1e-4), (out_q, ref_q)

    print("KERNEL_OK")
</pallas_src>

<mosaic_0001>
module attributes {stable_mosaic.version = 11 : i64} {
  func.func @kernel(%arg0: i32, %arg1: i32, %arg2: memref<8x256xf32, #tpu.memory_space<vmem>>, %arg3: memref<3x8x256xf32, #tpu.memory_space<vmem>>, %arg4: memref<1x8xf32, #tpu.memory_space<vmem>>, %arg5: memref<8x8xf32, #tpu.memory_space<vmem>>, %arg6: memref<8x8xf32, #tpu.memory_space<vmem>>) attributes {dimension_semantics = [#tpu.dimension_semantics<parallel>, #tpu.dimension_semantics<arbitrary>], iteration_bounds = array<i64: 1, 3>, scalar_prefetch = 0 : i64, scratch_operands = 1 : i64, tpu.core_type = #tpu.core_type<tc>, window_params = [{transform_indices = @transform_0, window_bounds = array<i64: 8, 256>}, {pipeline_mode = #tpu.pipeline_mode<synchronous>, transform_indices = @transform_1, window_bounds = array<i64: 3, 8, 256>}, {pipeline_mode = #tpu.pipeline_mode<synchronous>, transform_indices = @transform_2, window_bounds = array<i64: 1, 8>}, {transform_indices = @transform_3, window_bounds = array<i64: 8, 8>}]} {
    %c0_i32 = arith.constant 0 : i32
    %0 = arith.cmpi eq, %arg1, %c0_i32 : i32
    %1 = arith.extui %0 : i1 to i32
    %c0_i32_0 = arith.constant 0 : i32
    %2 = arith.cmpi ne, %1, %c0_i32_0 : i32
    scf.if %2 {
      %cst_9 = arith.constant 0.000000e+00 : f32
      %14 = vector.broadcast %cst_9 : f32 to vector<8x8xf32>
      %c0_10 = arith.constant 0 : index
      %c0_11 = arith.constant 0 : index
      %15 = vector.load %arg6[%c0_10, %c0_11] : memref<8x8xf32, #tpu.memory_space<vmem>>, vector<8x8xf32>
      tpu.vector_store %arg6[%c0_10, %c0_11], %14 {strides = array<i32>} : memref<8x8xf32, #tpu.memory_space<vmem>>, vector<8x8xf32>,
    } else {
    }
    %3 = arith.index_cast %arg1 : i32 to index
    %c0 = arith.constant 0 : index
    %c0_1 = arith.constant 0 : index
    %4 = vector.load %arg3[%3, %c0, %c0_1] : memref<3x8x256xf32, #tpu.memory_space<vmem>>, vector<1x8x256xf32>
    %5 = vector.shape_cast %4 : vector<1x8x256xf32> to vector<8x256xf32>
    %c0_2 = arith.constant 0 : index
    %c0_3 = arith.constant 0 : index
    %6 = vector.load %arg6[%c0_2, %c0_3] : memref<8x8xf32, #tpu.memory_space<vmem>>, vector<8x8xf32>
    %c0_4 = arith.constant 0 : index
    %c0_5 = arith.constant 0 : index
    %7 = vector.load %arg2[%c0_4, %c0_5] : memref<8x256xf32, #tpu.memory_space<vmem>>, vector<8x256xf32>
    %cst = arith.constant dense<0.000000e+00> : vector<8x8xf32>
    %8 = tpu.matmul %7, %5, %cst {dimension_numbers = #tpu.dot_dimension_numbers<[1], [1], [0], [0], [0, 0, 1, 0], [], []>} : vector<8x256xf32>, vector<8x256xf32>, vector<8x8xf32> -> vector<8x8xf32>
    %9 = arith.addf %6, %8 : vector<8x8xf32>
    %c0_6 = arith.constant 0 : index
    %c0_7 = arith.constant 0 : index
    %10 = vector.load %arg6[%c0_6, %c0_7] : memref<8x8xf32, #tpu.memory_space<vmem>>, vector<8x8xf32>
    tpu.vector_store %arg6[%c0_6, %c0_7], %9 {strides = array<i32>} : memref<8x8xf32, #tpu.memory_space<vmem>>, vector<8x8xf32>,
    %c2_i32 = arith.constant 2 : i32
    %11 = arith.cmpi eq, %arg1, %c2_i32 : i32
    %12 = arith.extui %11 : i1 to i32
    %c0_i32_8 = arith.constant 0 : i32
    %13 = arith.cmpi ne, %12, %c0_i32_8 : i32
    scf.if %13 {
      %c0_9 = arith.constant 0 : index
      %c0_10 = arith.constant 0 : index
      %14 = vector.load %arg6[%c0_9, %c0_10] : memref<8x8xf32, #tpu.memory_space<vmem>>, vector<8x8xf32>
      %c0_11 = arith.constant 0 : index
      %c0_12 = arith.constant 0 : index
      %15 = vector.load %arg4[%c0_11, %c0_12] : memref<1x8xf32, #tpu.memory_space<vmem>>, vector<1x8xf32>
      %16 = vector.broadcast %15 : vector<1x8xf32> to vector<8x8xf32>
      %17 = arith.addf %14, %16 : vector<8x8xf32>
      %cst_13 = arith.constant dense<0xFF800000> : vector<8xf32>
      %18 = vector.multi_reduction <maximumf>, %17, %cst_13 [1] : vector<8x8xf32> to vector<8xf32>
      %19 = vector.shape_cast %18 : vector<8xf32> to vector<8x1xf32>
      %20 = vector.broadcast %19 : vector<8x1xf32> to vector<8x8xf32>
      %21 = arith.subf %17, %20 : vector<8x8xf32>
      %22 = math.exp %21 : vector<8x8xf32>
      %cst_14 = arith.constant dense<0.000000e+00> : vector<8xf32>
      %23 = vector.multi_reduction <add>, %22, %cst_14 [1] : vector<8x8xf32> to vector<8xf32>
      %24 = vector.shape_cast %23 : vector<8xf32> to vector<8x1xf32>
      %25 = math.log %24 : vector<8x1xf32>
      %26 = vector.broadcast %25 : vector<8x1xf32> to vector<8x8xf32>
      %27 = arith.subf %21, %26 : vector<8x8xf32>
      %c0_15 = arith.constant 0 : index
      %c0_16 = arith.constant 0 : index
      %28 = vector.load %arg5[%c0_15, %c0_16] : memref<8x8xf32, #tpu.memory_space<vmem>>, vector<8x8xf32>
      tpu.vector_store %arg5[%c0_15, %c0_16], %27 {strides = array<i32>} : memref<8x8xf32, #tpu.memory_space<vmem>>, vector<8x8xf32>,
    } else {
    }
    return
  }
  func.func @transform_0(%arg0: i32, %arg1: i32) -> (i32, i32) {
    %c0_i32 = arith.constant 0 : i32
    return %arg0, %arg1 : i32, i32
  }
  func.func @transform_1(%arg0: i32, %arg1: i32) -> (i32, i32, i32) {
    %c0_i32 = arith.constant 0 : i32
    %c0_i32_0 = arith.constant 0 : i32
    %c0_i32_1 = arith.constant 0 : i32
    %c0_i32_2 = arith.constant 0 : i32
    return %c0_i32, %c0_i32_0, %c0_i32_1 : i32, i32, i32
  }
  func.func @transform_2(%arg0: i32, %arg1: i32) -> (i32, i32) {
    %c0_i32 = arith.constant 0 : i32
    %c0_i32_0 = arith.constant 0 : i32
    %c0_i32_1 = arith.constant 0 : i32
    return %c0_i32, %c0_i32_0 : i32, i32
  }
  func.func @transform_3(%arg0: i32, %arg1: i32) -> (i32, i32) {
    %c0_i32 = arith.constant 0 : i32
    %c0_i32_0 = arith.constant 0 : i32
    return %arg0, %c0_i32 : i32, i32
  }
}

</mosaic_0001>

<bundles_post_ra>
// kernel: regression_forward.1
= control target key start
LH: loop header
LB: loop body
LE: loop exit
PB: predicated region body
PF: predicated region fallthrough
CT: control target
= control target key end

     0   :  { %s466_s12 = smov 0   ;;  %s468_s13 = smov 0   ;;  %s515_s0 = inlined_call_operand.vmem [shape: f32[8,768], index: 0, kind: input, shape index: {}]   ;;  %s516_s1 = inlined_call_operand.vmem [shape: f32[3,8,256], index: 1, kind: input, shape index: {}]   ;;  %s517_s2 = inlined_call_operand.vmem [shape: f32[1,8], index: 2, kind: input, shape index: {}]   ;;  %s518_s3 = inlined_call_operand.vmem [shape: f32[8,8], index: 3, kind: output, shape index: {}]  }
   0x1   :  { %s470_s14 = smov 0  }
   0x2 LB: > { %s22_s15 = sadd.s32 1, %s439_s13  ;;  %p380_p0 = scmp.ge.s32.totalorder %s443_s14, 1  ;;  %s443_s14 = sphi %s470_s14, %s13_s14   ;;  %s439_s13 = sphi %s468_s13, %s520_s13   ;;  %s435_s12 = sphi %s466_s12, %s519_s12  }
   0x3   : > { %p23_p1 = scmp.ge.s32.totalorder %s22_s15, 3  ;;  %p156_p2 = scmp.lt.s32.totalorder %s443_s14, 4 }
   0x5   : > { %s522_s15 = smov (%p23_p1, %s22_s15), 0  ;;  %p157_p3 = pnand %p380_p0, %p156_p2 }
   0x6   : > { %s381_s16 = sshll.u32 (!%p157_p3), %s435_s12, 1  ;;  %p383_p5 = scmp.ne.s32.totalorder (!%p157_p3), %s435_s12, 0 }
   0x7   : > { %160 = sbr.rel (%p157_p3) target bundleno = 569 (0x239), region = 32  ;;  %p186_p4 = scmp.lt.s32.totalorder (!%p157_p3), %s381_s16, 5 }
   0xe   : > { %s524_s16 = smov (!%p186_p4, %s381_s16), 5  ;;  %200 = sbr.rel (%p383_p5) target bundleno = 21 (0x15), region = 36 }
   0xf   : > { %s382_s17 = sshll.u32 %s524_s16, 3  ;;  %vm201_vm0 = vcmask (!%p383_p5), 64512   ;;  %v445_v0 = vmov (!%p383_p5), 0.0  }
  0x10   : > { %s191_s20 = scalar_lea.vmem %s515_s0, %s382_s17  ;;  %202 = vst.msk [vmem:[#allocation2] sm:$0xff] (!%p383_p5), %vm201_vm0, %v445_v0 }
  0x15 PF: > { %s391_s21 = sshll.u32 %s435_s12, 4  ;;  %v210_v1 = vld [vmem:[%s191_s20 + $0x8] sm:$0xff]  ;;  %v209_v4 = vld [vmem:[%s191_s20] sm:$0xff]  ;;  %vm282_vm1 = vcmask 64512   ;;  %p386_p6 = scmp.ne.s32.totalorder %s435_s12, 2 }
  0x16   : > { %s205_s24 = scalar_lea.vmem %s516_s1, %s391_s21  ;;  %275 = vmatprep.mubr.f32.mxu0 %v210_v1  ;;  %v387_v10 = vld [vmem:[%s517_s2] ss:$0 sm:$0xff] (!%p386_p6) }
  0x17   : > { %v207_v2 = vld [vmem:[%s205_s24 + $0x8] sm:$0xff]  ;;  %v206_v3 = vld [vmem:[%s205_s24] sm:$0xff] }
  0x18   : > { %211 = vmatprep.subr.mxu0 %v207_v2  ;;  %v208_v5 = vld [vmem:[#allocation2] sm:$0xff] }
  0x19   : > { %212 = vmatpush1.xpose.msra.mxu0 %v206_v3 }
  0x1c   : > { %276 = vmatmul.mubr.f32.vlgmr.msra.gmra.mrb[0].mxu0 %v209_v4 }
  0xec   : > { %287 = sbr.rel (%p386_p6) target bundleno = 569 (0x239), region = 40 }
  0xef   : > { %v277_v6 = vpop.f32.mrb[0].mxu0 }
  0xf0   : > { %v281_v7 = vadd.f32 %v277_v6, %v208_v5  ;;  %v279_v8 = vpop.f32.mrb[1].mxu0 }
  0xf2   : > { %283 = vst.msk [vmem:[#allocation2] sm:$0xff] %vm282_vm1, %v281_v7 }
  0xf9   : > { %v288_v9 = vld [vmem:[#allocation2] sm:$0xff] }
  0xfa   : > { %v296_v11 = vadd.f32 %v387_v10, %v288_v9 }
  0xfc   : > { %v297_v12 = vsel %vm282_vm1, %v296_v11, -inf }
  0xfd   : > { %298 = vmax.xlane.f32.xlu0 %v297_v12 }
 0x18a   : > { %v299_v13 = vpop.xlane.xlu0 %298 }
 0x18b   : > { %v300_v14 = vsub.f32 %v296_v11, %v299_v13 }
 0x18d   : > { %v301_v15 = vmul.f32 1.442695, %v300_v14 }
 0x18f   : > { %417 = vpow2.f32 %v301_v15 }
 0x199   : > { %v418_v16 = vpop.eup %417 }
 0x19a   : > { %v303_v17 = vsel %vm282_vm1, %v418_v16, 0.0 }
 0x19b   : > { %304 = vadd.xlane.f32.xlu0 %v303_v17 }
 0x228   : > { %v305_v18 = vpop.xlane.xlu0 %304 }
 0x229   : > { %419 = vlog2.f32 %v305_v18 }
 0x233   : > { %v420_v19 = vpop.eup %419 }
 0x234   : > { %v307_v20 = vmul.f32 0.6931472, %v420_v19 }
 0x236   : > { %v308_v21 = vsub.f32 %v300_v14, %v307_v20 }
 0x238   : > { %309 = vst.msk [vmem:[%s518_s3] sm:$0xff] %vm282_vm1, %v308_v21 }
 0x239 PF: > { %s13_s14 = sadd.s32 1, %s443_s14   ;;  %s519_s12 = smov %s439_s13 }
 0x23a   : > { %p10_p7 = scmp.ge.s32.totalorder %s13_s14, 5   ;;  %s520_s13 = smov %s522_s15 }
 0x23c   :  { %12 = sbr.rel (!%p10_p7) target bundleno = 2 (0x2), region = 71 }

</bundles_post_ra>
